<compile_context>
chip_gen: v5e
topology: v5e:2x2
jax: 0.10.0
libtpu: 0.0.40
codegen_flags: <defaults>
</compile_context>

<pallas_src>
import functools

import jax
import jax.numpy as jnp
from jax.experimental import pallas as pl
from jax.experimental.pallas import tpu as pltpu

EPS_CLIP = 0.1
F_IN, H1, H2, F_OUT = 15, 32, 16, 1
F_IN_PAD = 16          # 15 -> 16 features (multiple of 8): 64 B/row in HBM
MAX_TILE_B = 2048      # rows per grid step; a few MiB of VMEM, fits every gen


def _round_up(n, m):
    return ((n + m - 1) // m) * m


def _tiles(batch):
    # Minimal padding: split batch as evenly as possible into <=MAX_TILE_B tiles.
    n_tiles = -(-batch // MAX_TILE_B)
    tile_b = _round_up(-(-batch // n_tiles), 8)
    return tile_b, n_tiles * tile_b, n_tiles


def _pad2(a, rows, cols):
    a = jnp.asarray(a, jnp.float32)
    out = jnp.zeros((rows, cols), jnp.float32)
    return out.at[: a.shape[0], : a.shape[1]].set(a)


def _mlp(x, w1, b1, w2, b2, w3r, b3):
    # Linear -> ReLU -> Linear -> ReLU -> (rank-1 Linear) -> Sigmoid.
    h1 = jnp.maximum(jnp.dot(x, w1, preferred_element_type=jnp.float32) + b1, 0.0)
    h2 = jnp.maximum(jnp.dot(h1, w2, preferred_element_type=jnp.float32) + b2, 0.0)
    # Third layer has a single output unit: VPU multiply + XLU lane-reduce,
    # producing (tile_b, 1) directly instead of a padded MXU matmul.
    z = jnp.sum(h2 * w3r, axis=-1, keepdims=True) + b3
    return 1.0 / (1.0 + jnp.exp(-z))


def mlp_kernel(x_ref, w1_ref, b1_ref, w2_ref, b2_ref, w3_ref, b3_ref, o_ref):
    o_ref[...] = _mlp(x_ref[...], w1_ref[...], b1_ref[...], w2_ref[...],
                      b2_ref[...], w3_ref[...], b3_ref[...])


def loss_kernel(x_ref, w1_ref, b1_ref, w2_ref, b2_ref, w3_ref, b3_ref,
                va_ref, out_ref, *, batch, tile_b):
    i = pl.program_id(0)
    logits = _mlp(x_ref[...], w1_ref[...], b1_ref[...], w2_ref[...],
                  b2_ref[...], w3_ref[...], b3_ref[...])
    v = va_ref[:, 0:1]                                    # packed (value, advantage)
    adv = va_ref[:, 1:2]
    r = jnp.exp(logits - v)
    loss1 = r * adv
    loss2 = jnp.clip(r, 1.0 - EPS_CLIP, 1.0 + EPS_CLIP) * adv
    loss = -jnp.minimum(loss1, loss2)

    # In-kernel row-validity mask; 1/batch baked in (== torch.mean over [B,1]).
    rows = jax.lax.broadcasted_iota(jnp.int32, (tile_b, 1), 0) + i * tile_b
    out_ref[0, 0] = jnp.sum(jnp.where(rows < batch, loss, 0.0)) * (1.0 / batch)


def _weight_specs():
    # Constant index maps -> resident in VMEM across all grid steps.
    return [
        pl.BlockSpec((F_IN_PAD, H1), lambda i: (0, 0)),   # w1 (16, 32)
        pl.BlockSpec((1, H1), lambda i: (0, 0)),          # b1 (1, 32)
        pl.BlockSpec((H1, H2), lambda i: (0, 0)),         # w2 (32, 16)
        pl.BlockSpec((1, H2), lambda i: (0, 0)),          # b2 (1, 16)
        pl.BlockSpec((1, H2), lambda i: (0, 0)),          # w3 row (1, 16)
        pl.BlockSpec((1, 1), lambda i: (0, 0)),           # b3 (1, 1)
    ]


@jax.jit
def _infer_impl(x, pw1, pb1, pw2, pb2, w3r, b3):
    batch = x.shape[0]
    tile_b, b_pad, n_tiles = _tiles(batch)
    xp = _pad2(x, b_pad, F_IN_PAD)                        # fused into the XLA program
    out = pl.pallas_call(
        mlp_kernel,
        out_shape=jax.ShapeDtypeStruct((b_pad, F_OUT), jnp.float32),
        grid=(n_tiles,),
        in_specs=[pl.BlockSpec((tile_b, F_IN_PAD), lambda i: (i, 0))] + _weight_specs(),
        out_specs=pl.BlockSpec((tile_b, F_OUT), lambda i: (i, 0)),
        compiler_params=pltpu.CompilerParams(dimension_semantics=("parallel",)),
    )(xp, pw1, pb1, pw2, pb2, w3r, b3)
    return out[:batch]


@jax.jit
def _loss_impl(x, value, advantage, pw1, pb1, pw2, pb2, w3r, b3):
    batch = x.shape[0]
    tile_b, b_pad, n_tiles = _tiles(batch)
    xp = _pad2(x, b_pad, F_IN_PAD)
    va = jnp.concatenate(
        [value.reshape(batch, 1), advantage.reshape(batch, 1)], axis=1)
    vap = _pad2(va, b_pad, 2)
    kernel = functools.partial(loss_kernel, batch=batch, tile_b=tile_b)
    partials = pl.pallas_call(
        kernel,
        out_shape=jax.ShapeDtypeStruct((n_tiles, 1), jnp.float32),
        grid=(n_tiles,),
        in_specs=[pl.BlockSpec((tile_b, F_IN_PAD), lambda i: (i, 0))]
        + _weight_specs()
        + [pl.BlockSpec((tile_b, 2), lambda i: (i, 0))],
        out_specs=pl.BlockSpec((1, 1), lambda i: (i, 0),
                               memory_space=pltpu.MemorySpace.SMEM),
        compiler_params=pltpu.CompilerParams(dimension_semantics=("parallel",)),
    )(xp, pw1, pb1, pw2, pb2, w3r, b3, vap)
    return jnp.sum(partials)


class PolicyPallas:
    """JAX/Pallas port of the PyTorch `Policy` module."""

    def __init__(self, key=None):
        if key is None:
            key = jax.random.PRNGKey(42)
        ks = jax.random.split(key, 6)

        def linear(kw, kb, fin, fout):
            bound = 1.0 / float(fin) ** 0.5  # PyTorch nn.Linear default init
            w = jax.random.uniform(kw, (fin, fout), jnp.float32, -bound, bound)
            b = jax.random.uniform(kb, (fout,), jnp.float32, -bound, bound)
            return w, b

        self.w1, self.b1 = linear(ks[0], ks[1], F_IN, H1)
        self.w2, self.b2 = linear(ks[2], ks[3], H1, H2)
        self.w3, self.b3 = linear(ks[4], ks[5], H2, F_OUT)

        # Kernel-side parameter layouts (only w1 needs a single zero row of padding;
        # padding is inert: relu(0) = 0).
        self.pw1 = _pad2(self.w1, F_IN_PAD, H1)           # (16, 32)
        self.pb1 = jnp.asarray(self.b1, jnp.float32).reshape(1, H1)
        self.pw2 = jnp.asarray(self.w2, jnp.float32)      # (32, 16)
        self.pb2 = jnp.asarray(self.b2, jnp.float32).reshape(1, H2)
        self.w3r = jnp.asarray(self.w3, jnp.float32).reshape(1, H2)   # (1, 16)
        self.pb3 = jnp.asarray(self.b3, jnp.float32).reshape(1, 1)

        self.gamma = 0.99
        self.eps_clip = EPS_CLIP

    def _params(self):
        return (self.pw1, self.pb1, self.pw2, self.pb2, self.w3r, self.pb3)

    # TODO(synk): state_to_tensor / pre_process are host-side numpy helpers in the
    # torch module; they have no kernel equivalent and are intentionally omitted.
    def forward(self, d_obs, value=None, advantage=None, deterministic=False):
        d_obs = jnp.asarray(d_obs, jnp.float32)
        if d_obs.ndim == 1:
            d_obs = d_obs[None, :]
        if value is None:
            return _infer_impl(d_obs, *self._params())    # caller takes [0] like torch
        value = jnp.asarray(value, jnp.float32).reshape(-1, F_OUT)
        advantage = jnp.asarray(advantage, jnp.float32).reshape(-1, F_OUT)
        return _loss_impl(d_obs, value, advantage, *self._params())

    __call__ = forward


def _reference(policy, d_obs, value=None, advantage=None):
    h1 = jnp.maximum(d_obs @ policy.w1 + policy.b1, 0.0)
    h2 = jnp.maximum(h1 @ policy.w2 + policy.b2, 0.0)
    logits = 1.0 / (1.0 + jnp.exp(-(h2 @ policy.w3 + policy.b3)))
    if value is None:
        return logits
    r = jnp.exp(logits - value)
    loss1 = r * advantage
    loss2 = jnp.clip(r, 1.0 - EPS_CLIP, 1.0 + EPS_CLIP) * advantage
    return jnp.mean(-jnp.minimum(loss1, loss2))


if __name__ == "__main__":
    key = jax.random.PRNGKey(0)
    policy = PolicyPallas()

    # Small batch (single tile) and a larger batch (non-multiple-of-8 batch) to
    # exercise row padding, the masked-mean reduction and the narrow output path.
    for B in (2, 300):
        k_obs, k_adv = jax.random.split(jax.random.fold_in(key, B))
        d_obs = jax.random.normal(k_obs, (B, F_IN), jnp.float32)

        # Inference path (value is None): returns sigmoid logits.
        logits = jax.block_until_ready(policy(d_obs))
        ref_logits = _reference(policy, d_obs)
        assert jnp.allclose(logits, ref_logits, atol=1e-5), (B, logits, ref_logits)

        # Training path: PPO clipped surrogate loss.
        old_value = logits
        advantage = jax.random.normal(k_adv, (B, F_OUT), jnp.float32)
        loss = jax.block_until_ready(
            policy(d_obs, value=old_value, advantage=advantage))
        ref_loss = _reference(policy, d_obs, old_value, advantage)
        assert jnp.allclose(loss, ref_loss, atol=1e-5), (B, loss, ref_loss)

    print("KERNEL_OK")
</pallas_src>

<mosaic_0001>
module attributes {stable_mosaic.version = 11 : i64} {
  func.func @mlp_kernel(%arg0: i32, %arg1: memref<8x16xf32, #tpu.memory_space<vmem>>, %arg2: memref<16x32xf32, #tpu.memory_space<vmem>>, %arg3: memref<1x32xf32, #tpu.memory_space<vmem>>, %arg4: memref<32x16xf32, #tpu.memory_space<vmem>>, %arg5: memref<1x16xf32, #tpu.memory_space<vmem>>, %arg6: memref<1x16xf32, #tpu.memory_space<vmem>>, %arg7: memref<1x1xf32, #tpu.memory_space<vmem>>, %arg8: memref<8x1xf32, #tpu.memory_space<vmem>>) attributes {dimension_semantics = [#tpu.dimension_semantics<parallel>], iteration_bounds = array<i64: 1>, scalar_prefetch = 0 : i64, scratch_operands = 0 : i64, tpu.core_type = #tpu.core_type<tc>, window_params = [{transform_indices = @transform_0, window_bounds = array<i64: 8, 16>}, {pipeline_mode = #tpu.pipeline_mode<synchronous>, transform_indices = @transform_1, window_bounds = array<i64: 16, 32>}, {pipeline_mode = #tpu.pipeline_mode<synchronous>, transform_indices = @transform_2, window_bounds = array<i64: 1, 32>}, {pipeline_mode = #tpu.pipeline_mode<synchronous>, transform_indices = @transform_3, window_bounds = array<i64: 32, 16>}, {pipeline_mode = #tpu.pipeline_mode<synchronous>, transform_indices = @transform_4, window_bounds = array<i64: 1, 16>}, {pipeline_mode = #tpu.pipeline_mode<synchronous>, transform_indices = @transform_5, window_bounds = array<i64: 1, 16>}, {pipeline_mode = #tpu.pipeline_mode<synchronous>, transform_indices = @transform_6, window_bounds = array<i64: 1, 1>}, {transform_indices = @transform_7, window_bounds = array<i64: 8, 1>}]} {
    %c0 = arith.constant 0 : index
    %c0_0 = arith.constant 0 : index
    %0 = vector.load %arg1[%c0, %c0_0] : memref<8x16xf32, #tpu.memory_space<vmem>>, vector<8x16xf32>
    %c0_1 = arith.constant 0 : index
    %c0_2 = arith.constant 0 : index
    %1 = vector.load %arg2[%c0_1, %c0_2] : memref<16x32xf32, #tpu.memory_space<vmem>>, vector<16x32xf32>
    %c0_3 = arith.constant 0 : index
    %c0_4 = arith.constant 0 : index
    %2 = vector.load %arg3[%c0_3, %c0_4] : memref<1x32xf32, #tpu.memory_space<vmem>>, vector<1x32xf32>
    %c0_5 = arith.constant 0 : index
    %c0_6 = arith.constant 0 : index
    %3 = vector.load %arg4[%c0_5, %c0_6] : memref<32x16xf32, #tpu.memory_space<vmem>>, vector<32x16xf32>
    %c0_7 = arith.constant 0 : index
    %c0_8 = arith.constant 0 : index
    %4 = vector.load %arg5[%c0_7, %c0_8] : memref<1x16xf32, #tpu.memory_space<vmem>>, vector<1x16xf32>
    %c0_9 = arith.constant 0 : index
    %c0_10 = arith.constant 0 : index
    %5 = vector.load %arg6[%c0_9, %c0_10] : memref<1x16xf32, #tpu.memory_space<vmem>>, vector<1x16xf32>
    %c0_11 = arith.constant 0 : index
    %c0_12 = arith.constant 0 : index
    %6 = vector.load %arg7[%c0_11, %c0_12] : memref<1x1xf32, #tpu.memory_space<vmem>>, vector<1x1xf32>
    %cst = arith.constant dense<0.000000e+00> : vector<8x32xf32>
    %7 = tpu.matmul %0, %1, %cst {dimension_numbers = #tpu.dot_dimension_numbers<[1], [0], [0], [1], [0, 0, 1, 1], [], []>} : vector<8x16xf32>, vector<16x32xf32>, vector<8x32xf32> -> vector<8x32xf32>
    %8 = vector.broadcast %2 : vector<1x32xf32> to vector<8x32xf32>
    %9 = arith.addf %7, %8 : vector<8x32xf32>
    %cst_13 = arith.constant 0.000000e+00 : f32
    %10 = vector.broadcast %cst_13 : f32 to vector<8x32xf32>
    %11 = arith.maximumf %9, %10 : vector<8x32xf32>
    %cst_14 = arith.constant dense<0.000000e+00> : vector<8x16xf32>
    %12 = tpu.matmul %11, %3, %cst_14 {dimension_numbers = #tpu.dot_dimension_numbers<[1], [0], [0], [1], [0, 0, 1, 1], [], []>} : vector<8x32xf32>, vector<32x16xf32>, vector<8x16xf32> -> vector<8x16xf32>
    %13 = vector.broadcast %4 : vector<1x16xf32> to vector<8x16xf32>
    %14 = arith.addf %12, %13 : vector<8x16xf32>
    %cst_15 = arith.constant 0.000000e+00 : f32
    %15 = vector.broadcast %cst_15 : f32 to vector<8x16xf32>
    %16 = arith.maximumf %14, %15 : vector<8x16xf32>
    %17 = vector.broadcast %5 : vector<1x16xf32> to vector<8x16xf32>
    %18 = arith.mulf %16, %17 : vector<8x16xf32>
    %cst_16 = arith.constant dense<0.000000e+00> : vector<8xf32>
    %19 = vector.multi_reduction <add>, %18, %cst_16 [1] : vector<8x16xf32> to vector<8xf32>
    %20 = vector.shape_cast %19 : vector<8xf32> to vector<8x1xf32>
    %21 = vector.broadcast %6 : vector<1x1xf32> to vector<8x1xf32>
    %22 = arith.addf %20, %21 : vector<8x1xf32>
    %cst_17 = arith.constant 0.000000e+00 : f32
    %23 = vector.broadcast %cst_17 : f32 to vector<8x1xf32>
    %24 = arith.subf %23, %22 : vector<8x1xf32>
    %25 = math.exp %24 : vector<8x1xf32>
    %cst_18 = arith.constant 1.000000e+00 : f32
    %26 = vector.broadcast %cst_18 : f32 to vector<8x1xf32>
    %27 = arith.addf %26, %25 : vector<8x1xf32>
    %cst_19 = arith.constant 1.000000e+00 : f32
    %28 = vector.broadcast %cst_19 : f32 to vector<8x1xf32>
    %29 = arith.divf %28, %27 : vector<8x1xf32>
    %c0_20 = arith.constant 0 : index
    %c0_21 = arith.constant 0 : index
    %30 = vector.load %arg8[%c0_20, %c0_21] : memref<8x1xf32, #tpu.memory_space<vmem>>, vector<8x1xf32>
    tpu.vector_store %arg8[%c0_20, %c0_21], %29 {strides = array<i32>} : memref<8x1xf32, #tpu.memory_space<vmem>>, vector<8x1xf32>,
    return
  }
  func.func @transform_0(%arg0: i32) -> (i32, i32) {
    %c0_i32 = arith.constant 0 : i32
    %c0_i32_0 = arith.constant 0 : i32
    return %arg0, %c0_i32 : i32, i32
  }
  func.func @transform_1(%arg0: i32) -> (i32, i32) {
    %c0_i32 = arith.constant 0 : i32
    %c0_i32_0 = arith.constant 0 : i32
    %c0_i32_1 = arith.constant 0 : i32
    return %c0_i32, %c0_i32_0 : i32, i32
  }
  func.func @transform_2(%arg0: i32) -> (i32, i32) {
    %c0_i32 = arith.constant 0 : i32
    %c0_i32_0 = arith.constant 0 : i32
    %c0_i32_1 = arith.constant 0 : i32
    return %c0_i32, %c0_i32_0 : i32, i32
  }
  func.func @transform_3(%arg0: i32) -> (i32, i32) {
    %c0_i32 = arith.constant 0 : i32
    %c0_i32_0 = arith.constant 0 : i32
    %c0_i32_1 = arith.constant 0 : i32
    return %c0_i32, %c0_i32_0 : i32, i32
  }
  func.func @transform_4(%arg0: i32) -> (i32, i32) {
    %c0_i32 = arith.constant 0 : i32
    %c0_i32_0 = arith.constant 0 : i32
    %c0_i32_1 = arith.constant 0 : i32
    return %c0_i32, %c0_i32_0 : i32, i32
  }
  func.func @transform_5(%arg0: i32) -> (i32, i32) {
    %c0_i32 = arith.constant 0 : i32
    %c0_i32_0 = arith.constant 0 : i32
    %c0_i32_1 = arith.constant 0 : i32
    return %c0_i32, %c0_i32_0 : i32, i32
  }
  func.func @transform_6(%arg0: i32) -> (i32, i32) {
    %c0_i32 = arith.constant 0 : i32
    %c0_i32_0 = arith.constant 0 : i32
    %c0_i32_1 = arith.constant 0 : i32
    return %c0_i32, %c0_i32_0 : i32, i32
  }
  func.func @transform_7(%arg0: i32) -> (i32, i32) {
    %c0_i32 = arith.constant 0 : i32
    %c0_i32_0 = arith.constant 0 : i32
    return %arg0, %c0_i32 : i32, i32
  }
}

</mosaic_0001>

<bundles_post_ra>
// kernel: _infer_impl.1
= control target key start
LH: loop header
LB: loop body
LE: loop exit
PB: predicated region body
PF: predicated region fallthrough
CT: control target
= control target key end

     0   :  { %vm42_vm0 = vcmask 130048   ;;  %vm70_vm1 = vcmask 261120   ;;  %vm125_vm5 = vcmask 7168   ;;  %s219_s1 = inlined_call_operand.vmem [shape: f32[16,32], index: 1, kind: input, shape index: {}]   ;;  %s220_s0 = inlined_call_operand.vmem [shape: f32[8,16], index: 0, kind: input, shape index: {}]   ;;  %s221_s3 = inlined_call_operand.vmem [shape: f32[32,16], index: 3, kind: input, shape index: {}]   ;;  %s222_s2 = inlined_call_operand.vmem [shape: f32[1,32], index: 2, kind: input, shape index: {}]   ;;  %s223_s4 = inlined_call_operand.vmem [shape: f32[1,16], index: 4, kind: input, shape index: {}]   ;;  %s224_s5 = inlined_call_operand.vmem [shape: f32[1,16], index: 5, kind: input, shape index: {}]   ;;  %s225_s6 = inlined_call_operand.<no memory space> [shape: f32[1,1], index: 6, kind: input, shape index: {}]   ;;  %s226_s7 = inlined_call_operand.vmem [shape: f32[8,1], index: 7, kind: output, shape index: {}]  }
   0x1   :  { %v30_v0 = vld [vmem:[%s219_s1 + $0x8] sm:$0xff]  ;;  %v29_v1 = vld [vmem:[%s219_s1] sm:$0xff]  ;;  %v35_v3 = vld [vmem:[%s221_s3 + $0x18] sm:$0xff]  ;;  %v12_v11 = vstv %s225_s6 }
   0x2   :  { %60 = vmatpush.msra.mxu0 %v30_v0  ;;  %v28_v2 = vld [vmem:[%s220_s0] sm:$0xff]  ;;  %86 = vmatpush.msra.mxu1 %v35_v3  ;;  %v34_v4 = vld [vmem:[%s221_s3 + $0x10] sm:$0xff]  ;;  %v33_v5 = vld [vmem:[%s221_s3 + $0x8] sm:$0xff]  ;;  %13 = vst [vmem:[#allocation2] sm:$0x1] %v12_v11 }
   0x3   :  { %v32_v6 = vld [vmem:[%s221_s3] sm:$0xff] }
   0x4   :  { %61 = vmatpush.msra.mxu0 %v29_v1  ;;  %87 = vmatpush.msra.mxu1 %v34_v4  ;;  %v133_v7 = vld [vmem:[%s222_s2] ss:$0 sm:$0xff] }
   0x5   :  { %131 = vmatmul.msk.f32.vlgmr.msra.gmra.mxu0 %vm42_vm0, %v28_v2  ;;  %v134_v12 = vld [vmem:[%s223_s4] ss:$0 sm:$0xff] }
   0x6   :  { %88 = vmatpush.msra.mxu1 %v33_v5  ;;  %v135_v15 = vld [vmem:[%s224_s5] ss:$0 sm:$0xff] }
   0x8   :  { %89 = vmatpush.msra.mxu1 %v32_v6 }
   0x9   :  { %v136_v19 = vld [vmem:[#allocation2] ss:$0 sm:$0xff] }
  0x82   :  { %v63_v8 = vpop.f32.mrf.mxu0 }
  0x83   :  { %v64_v9 = vadd.f32 %v133_v7, %v63_v8 }
  0x85   :  { %v66_v10 = vmax.f32 %v64_v9, 0.0 }
  0x87   :  { %132 = vmatmul.msk.f32.vlgmr.msra.gmra.mxu1 %vm70_vm1, %v66_v10 }
 0x104   :  { %v91_v13 = vpop.f32.mrf.mxu1 }
 0x105   :  { %v92_v14 = vadd.f32 %v134_v12, %v91_v13 }
 0x107   :  { %v94_v16 = vmax.f32 %v92_v14, 0.0 }
 0x109   :  { %v98_v17 = vmul.f32 %v135_v15, %v94_v16 }
 0x10b   :  { %v99_v18 = vsel %vm42_vm0, %v98_v17, 0.0 }
 0x10c   :  { %100 = vadd.xlane.f32.xlu0 %v99_v18 }
 0x17f   :  { %v101_v20 = vpop.xlane.xlu0 %100 }
 0x180   :  { %v105_v21 = vadd.f32 %v136_v19, %v101_v20 }
 0x182   :  { %v106_v22 = vsub.f32 0.0, %v105_v21 }
 0x184   :  { %v107_v23 = vmul.f32 1.442695, %v106_v22 }
 0x186   :  { %137 = vpow2.f32 %v107_v23 }
 0x18c   :  { %v138_v24 = vpop.eup %137 }
 0x18d   :  { %v109_v25 = vadd.f32 1.0, %v138_v24 }
 0x18f   :  { %139 = vrcp.f32 %v109_v25  ;;  %v121_v29 = vand.u32 2147483648, %v109_v25  ;;  %v119_v31 = vand.u32 2147483647, %v109_v25  ;;  %vm115_vm3 = vweird.f32 %v109_v25 }
 0x191   :  { %v122_v33 = vor.u32 1.1754944e-38, %v121_v29  ;;  %vm120_vm6 = vcmp.eq.f32.partialorder %v119_v31, 8.507059e+37 }
 0x195   :  { %v140_v26 = vpop.eup %139 }
 0x196   :  { %v111_v27 = vmul.f32 %v140_v26, %v109_v25  ;;  %vm116_vm2 = vweird.f32 %v140_v26 }
 0x197   :  { %vm117_vm4 = vmor %vm115_vm3, %vm116_vm2 }
 0x198   :  { %v112_v28 = vsub.f32 1.0, %v111_v27 }
 0x19a   :  { %v113_v30 = vmul.f32 %v140_v26, %v112_v28 }
 0x19c   :  { %v114_v32 = vadd.f32 %v140_v26, %v113_v30 }
 0x19e   :  { %v118_v34 = vsel %vm117_vm4, %v140_v26, %v114_v32 }
 0x19f   :  { %v123_v35 = vsel %vm120_vm6, %v122_v33, %v118_v34 }
 0x1a0   :  { %126 = vst.msk [vmem:[%s226_s7] sm:$0xff] %vm125_vm5, %v123_v35 }

</bundles_post_ra>
